<compile_context>
chip_gen: v6e
topology: v6e:2x2x1
jax: 0.10.0
libtpu: 0.0.40
codegen_flags: <defaults>
</compile_context>

<pallas_src>
import numpy as np
import jax
import jax.numpy as jnp
from jax.experimental import pallas as pl
from jax.experimental.pallas import tpu as pltpu  # noqa: F401  (TPU backend assumed)

# Model hyper-parameters (args.window_size=16, hidden=4, heads=2, n_layers=1)
BATCH = 2
WINDOW = 16                  # args.window_size (original_len)
LAT = WINDOW // 2            # latent_len
N_TOK = BATCH * LAT          # flattened token rows inside the kernel
HID = 4                      # self.hidden
HEADS = 2
DK = HID // HEADS
FF = 4 * HID                 # feed_forward_hidden
L1 = 128                     # linear1 width
OUT = 5                      # args.output_size
LN_EPS = 1e-6
GELU_C = 0.7978845608028654  # sqrt(2/pi)


# ----------------------------------------------------------------------------
# Parameter-slab layout: every entry starts at an 8-row-aligned offset of a
# (rows, 128) f32 slab; the kernel static-slices it with plain Python slices.
# ----------------------------------------------------------------------------
_SLAB_SPEC = (
    ("w6eo",      (6, 2 * HID)),          # conv taps for even|odd pooled positions
    ("bconv",     (1, 2 * HID)),
    ("pe",        (N_TOK, HID)),          # positional embedding tiled over batch
    ("ln0_w",     (1, HID)), ("ln0_b", (1, HID)),
    ("wqkv",      (HID, 3 * HID)), ("bqkv", (1, 3 * HID)),
    ("wo",        (HID, HID)), ("bo", (1, HID)),
    ("ln1_w",     (1, HID)), ("ln1_b", (1, HID)),
    ("wf1",       (HID, FF)), ("bf1", (1, FF)),
    ("wf2",       (FF, HID)), ("bf2", (1, HID)),
    ("ln2_w",     (1, HID)), ("ln2_b", (1, HID)),
    ("wdec",      (HID, 4 * HID)),         # deconv taps [W1 | W3 | W2 | W0]
    ("bd",        (1, HID)),
    ("wl1",       (HID, L1)), ("bl1", (1, L1)),
    ("wl2",       (L1, OUT)), ("bl2", (1, OUT)),
    ("head_mask", (2 * N_TOK, HID)),       # block-diag head selector for K/V
    ("mask_bias", (N_TOK, 2 * N_TOK)),     # 0 / -1e9 cross-batch additive mask
    ("shift_mat", (2 * N_TOK, 2 * N_TOK)), # block-diag [prev-shift ; next-shift]
)


def _build_layout():
    layout, off = {}, 0
    for name, shape in _SLAB_SPEC:
        layout[name] = (off, shape)
        off += -(-shape[0] // 8) * 8       # round rows up to a sublane tile
    return layout, off


_LAYOUT, _SLAB_ROWS = _build_layout()


# ----------------------------------------------------------------------------
# Single fused Pallas kernel: conv+pool -> embed -> LN -> MHA -> LN -> FF -> LN
# -> deconv -> tanh(linear1) -> linear2.   No grid; everything resides in VMEM.
# ----------------------------------------------------------------------------
def _transformer_kernel(xwin_ref, slab_ref, out_ref):
    f32 = jnp.float32
    N = N_TOK

    def ld(name):                          # static slice into the parameter slab
        off, (r, c) = _LAYOUT[name]
        return slab_ref[off:off + r, :c]

    def mm(a, b):
        return jnp.dot(a, b, preferred_element_type=f32)

    def layer_norm(x, w, b):
        mean = jnp.mean(x, axis=-1, keepdims=True)
        d = x - mean
        # torch .std(-1) is unbiased (divide by n-1); eps added to std, not var.
        var = jnp.sum(d * d, axis=-1, keepdims=True) * (1.0 / (x.shape[-1] - 1))
        return w * d / (jnp.sqrt(var) + LN_EPS) + b

    def gelu(x):
        return 0.5 * x * (1.0 + jnp.tanh(GELU_C * (x + 0.044715 * x * x * x)))

    # ---- Conv1d (replicate pad) + LPPool1d(p=2,k=2,s=2): one fused matmul ----
    conv = mm(xwin_ref[...], ld("w6eo")) + ld("bconv")          # (N, 2*HID)
    ce, co = conv[:, :HID], conv[:, HID:]
    x_tok = jnp.sqrt(ce * ce + co * co)                         # (N, HID)

    # ---- + positional embedding, LayerNorm (dropout = identity in eval) ----
    x = layer_norm(x_tok + ld("pe"), ld("ln0_w"), ld("ln0_b"))

    # ---- Multi-head self-attention (h=2, d_k=2), post-LN residual ----
    qkv = mm(x, ld("wqkv")) + ld("bqkv")                        # (N, 3*HID)
    q = qkv[:, :HID] * (1.0 / (DK ** 0.5))
    k = qkv[:, HID:2 * HID]
    v = qkv[:, 2 * HID:]
    hm = ld("head_mask")                                        # (2N, HID)
    k_blk = jnp.concatenate([k, k], axis=0) * hm                # block-diag K
    v_blk = jnp.concatenate([v, v], axis=0) * hm                # block-diag V
    # one score matmul covering both heads: cols [0:N]=head0, [N:2N]=head1
    s = jax.lax.dot_general(q, k_blk, (((1,), (1,)), ((), ())),
                            preferred_element_type=f32) + ld("mask_bias")
    s0, s1 = s[:, :N], s[:, N:]
    p0 = jnp.exp(s0 - jnp.max(s0, axis=-1, keepdims=True))
    p1 = jnp.exp(s1 - jnp.max(s1, axis=-1, keepdims=True))
    p0 = p0 * pl.reciprocal(jnp.sum(p0, axis=-1, keepdims=True), approx=True)
    p1 = p1 * pl.reciprocal(jnp.sum(p1, axis=-1, keepdims=True), approx=True)
    p = jnp.concatenate([p0, p1], axis=1)                       # (N, 2N)
    o = mm(p, v_blk)                                            # (N, HID) = [P0V0|P1V1]
    attn = mm(o, ld("wo")) + ld("bo")
    x = layer_norm(x + attn, ld("ln1_w"), ld("ln1_b"))

    # ---- position-wise feed forward (tanh-GELU), post-LN residual ----
    ff = mm(gelu(mm(x, ld("wf1")) + ld("bf1")), ld("wf2")) + ld("bf2")
    x = layer_norm(x + ff, ld("ln2_w"), ld("ln2_b"))

    # ---- ConvTranspose1d(HID, HID, k=4, stride=2, pad=1) ----
    # out[t=2s]   = x[s]@W[:,:,1] + x[s-1]@W[:,:,3] + b
    # out[t=2s+1] = x[s]@W[:,:,2] + x[s+1]@W[:,:,0] + b
    # All 4 taps in one matmul; neighbour shifts (zero at per-sample boundaries)
    # via one precomputed block-diagonal shift matmul.
    d = mm(x, ld("wdec"))                                       # (N,4H)=[xW1|xW3|xW2|xW0]
    a1, a3 = d[:, :HID], d[:, HID:2 * HID]
    a2, a0 = d[:, 2 * HID:3 * HID], d[:, 3 * HID:]
    shifted = mm(ld("shift_mat"), jnp.concatenate([a3, a0], axis=0))   # (2N, HID)
    y = jnp.concatenate([a1, a2], axis=0) + shifted + ld("bd")         # rows: even|odd

    # ---- head: tanh(Linear(4,128)) -> Linear(128,OUT) on row-stacked even/odd ----
    h = jnp.tanh(mm(y, ld("wl1")) + ld("bl1"))                  # (2N, 128)
    out_ref[...] = (mm(h, ld("wl2")) + ld("bl2")).astype(out_ref.dtype)


# ----------------------------------------------------------------------------
# One-time (outside jit) zero-FLOP layout prep: pack every weight/bias plus the
# constant masks, pre-transposed and pre-fused, into the (rows, 128) f32 slab.
# ----------------------------------------------------------------------------
def prepare_params(params, batch=BATCH):
    f32 = jnp.float32
    row = lambda v: jnp.asarray(v, f32).reshape(1, -1)

    cw = jnp.asarray(params["conv_w"], f32)                     # (HID, 5)
    z = jnp.zeros((1, HID), f32)
    w6e = jnp.concatenate([cw.T, z], axis=0)                    # even pooled position
    w6o = jnp.concatenate([z, cw.T], axis=0)                    # odd pooled position
    dw = jnp.asarray(params["deconv_w"], f32)                   # (ci, co, k)

    # constant masks (host-side numpy, built once)
    i = np.arange(N_TOK)
    prev = ((i[:, None] - 1 == i[None, :]) & (i[:, None] % LAT != 0))
    nxt = ((i[:, None] + 1 == i[None, :]) & (i[:, None] % LAT != LAT - 1))
    shift = np.zeros((2 * N_TOK, 2 * N_TOK), np.float32)
    shift[:N_TOK, :N_TOK] = prev
    shift[N_TOK:, N_TOK:] = nxt
    hm = np.zeros((2 * N_TOK, HID), np.float32)
    hm[:N_TOK, :DK] = 1.0
    hm[N_TOK:, DK:] = 1.0
    rb = i // LAT
    cb = (np.arange(2 * N_TOK) % N_TOK) // LAT
    mb = np.where(rb[:, None] == cb[None, :], 0.0, -1e9).astype(np.float32)

    entries = {
        "w6eo": jnp.concatenate([w6e, w6o], axis=1),
        "bconv": jnp.concatenate([row(params["conv_b"]), row(params["conv_b"])], axis=1),
        "pe": jnp.tile(jnp.asarray(params["pe"], f32), (batch, 1)),
        "ln0_w": row(params["ln0_w"]), "ln0_b": row(params["ln0_b"]),
        "wqkv": jnp.concatenate(
            [params["wq"].T, params["wk"].T, params["wv"].T], axis=1),
        "bqkv": jnp.concatenate(
            [row(params["bq"]), row(params["bk"]), row(params["bv"])], axis=1),
        "wo": params["wo"].T, "bo": row(params["bo"]),
        "ln1_w": row(params["ln1_w"]), "ln1_b": row(params["ln1_b"]),
        "wf1": params["ff1_w"].T, "bf1": row(params["ff1_b"]),
        "wf2": params["ff2_w"].T, "bf2": row(params["ff2_b"]),
        "ln2_w": row(params["ln2_w"]), "ln2_b": row(params["ln2_b"]),
        "wdec": jnp.concatenate(
            [dw[:, :, 1], dw[:, :, 3], dw[:, :, 2], dw[:, :, 0]], axis=1),
        "bd": row(params["deconv_b"]),
        "wl1": params["l1_w"].T, "bl1": row(params["l1_b"]),
        "wl2": params["l2_w"].T, "bl2": row(params["l2_b"]),
        "head_mask": jnp.asarray(hm),
        "mask_bias": jnp.asarray(mb),
        "shift_mat": jnp.asarray(shift),
    }

    slab = jnp.zeros((_SLAB_ROWS, 128), f32)
    for name, (off, (r, c)) in _LAYOUT.items():
        val = jnp.asarray(entries[name], f32).reshape(r, c)
        slab = slab.at[off:off + r, :c].set(val)
    return slab


# ----------------------------------------------------------------------------
# Hot-path wrapper: im2col (indexing only) + one pallas_call + even/odd interleave.
# ----------------------------------------------------------------------------
def transformer_forward(x, slab):
    """x: (BATCH, WINDOW) float32 -> (BATCH, WINDOW, OUT), matching Transformer.forward."""
    B, W = x.shape
    assert B == BATCH and W == WINDOW
    N = B * LAT

    # replicate pad by 2 and take even-start length-6 windows (zero-FLOP im2col)
    xp = jnp.pad(x, ((0, 0), (2, 2)), mode="edge")              # (B, W+4)
    idx = 2 * jnp.arange(LAT)[:, None] + jnp.arange(6)[None, :]
    xwin = xp[:, idx].reshape(N, 6).astype(jnp.float32)

    out = pl.pallas_call(
        _transformer_kernel,
        out_shape=jax.ShapeDtypeStruct((2 * N, OUT), jnp.float32),
    )(xwin, slab)

    # rows [0:N] are deconv positions t=2s, rows [N:2N] are t=2s+1 -> interleave
    even = out[:N].reshape(B, LAT, OUT)
    odd = out[N:].reshape(B, LAT, OUT)
    return jnp.stack([even, odd], axis=2).reshape(B, WINDOW, OUT)


# ----------------------------------------------------------------------------
# Deterministic parameter init (truncated-normal std=0.02 like the module;
# LayerNorm params stay at ones/zeros, as in truncated_normal_init()).
# ----------------------------------------------------------------------------
def init_params(key):
    def trunc(k, shape):
        return 0.02 * jax.random.truncated_normal(k, -2.0, 2.0, shape, jnp.float32)

    spec = [
        ("conv_w", (HID, 5)), ("conv_b", (HID,)),
        ("pe", (LAT, HID)),
        ("wq", (HID, HID)), ("bq", (HID,)),
        ("wk", (HID, HID)), ("bk", (HID,)),
        ("wv", (HID, HID)), ("bv", (HID,)),
        ("wo", (HID, HID)), ("bo", (HID,)),
        ("ff1_w", (FF, HID)), ("ff1_b", (FF,)),
        ("ff2_w", (HID, FF)), ("ff2_b", (HID,)),
        ("deconv_w", (HID, HID, 4)), ("deconv_b", (HID,)),
        ("l1_w", (L1, HID)), ("l1_b", (L1,)),
        ("l2_w", (OUT, L1)), ("l2_b", (OUT,)),
    ]
    keys = jax.random.split(key, len(spec))
    params = {name: trunc(k, shape) for (name, shape), k in zip(spec, keys)}
    for ln in ("ln0", "ln1", "ln2"):
        params[f"{ln}_w"] = jnp.ones((HID,), jnp.float32)
        params[f"{ln}_b"] = jnp.zeros((HID,), jnp.float32)
    return params


# ----------------------------------------------------------------------------
# Pure-JAX reference (independent path) for correctness checking.
# ----------------------------------------------------------------------------
def _ref_ln(x, w, b):
    mean = x.mean(-1, keepdims=True)
    std = jnp.sqrt(((x - mean) ** 2).sum(-1, keepdims=True) / (x.shape[-1] - 1))
    return w * (x - mean) / (std + LN_EPS) + b


def _ref_gelu(x):
    return 0.5 * x * (1.0 + jnp.tanh(GELU_C * (x + 0.044715 * x ** 3)))


def ref_forward(x, params):
    B, W = x.shape
    xp = jnp.pad(x, ((0, 0), (2, 2)), mode="edge")
    taps = jnp.stack([xp[:, k:k + W] for k in range(5)], axis=-1)      # (B, W, 5)
    conv = jnp.einsum("bik,ck->bci", taps, params["conv_w"]) \
        + params["conv_b"][None, :, None]                              # (B, HID, W)
    pooled = jnp.sqrt(conv[:, :, 0::2] ** 2 + conv[:, :, 1::2] ** 2)   # LPPool p=2
    h = jnp.transpose(pooled, (0, 2, 1)) + params["pe"][None]          # (B, LAT, HID)
    h = _ref_ln(h, params["ln0_w"], params["ln0_b"])

    q = h @ params["wq"].T + params["bq"]
    k = h @ params["wk"].T + params["bk"]
    v = h @ params["wv"].T + params["bv"]
    split = lambda t: t.reshape(B, LAT, HEADS, DK).transpose(0, 2, 1, 3)
    qh, kh, vh = split(q), split(k), split(v)
    s = jnp.einsum("bhqd,bhkd->bhqk", qh, kh) / jnp.sqrt(1.0 * DK)
    p = jax.nn.softmax(s, axis=-1)
    o = jnp.einsum("bhqk,bhkd->bhqd", p, vh).transpose(0, 2, 1, 3).reshape(B, LAT, HID)
    attn = o @ params["wo"].T + params["bo"]
    h = _ref_ln(h + attn, params["ln1_w"], params["ln1_b"])
    ff = _ref_gelu(h @ params["ff1_w"].T + params["ff1_b"]) @ params["ff2_w"].T \
        + params["ff2_b"]
    h = _ref_ln(h + ff, params["ln2_w"], params["ln2_b"])

    xin = jnp.transpose(h, (0, 2, 1))                                  # (B, ci, LAT)
    dw, db = params["deconv_w"], params["deconv_b"]
    out = jnp.zeros((B, HID, WINDOW), jnp.float32)
    for s_ in range(LAT):
        for k_ in range(4):
            t = 2 * s_ - 1 + k_
            if 0 <= t < WINDOW:
                out = out.at[:, :, t].add(
                    jnp.einsum("bi,io->bo", xin[:, :, s_], dw[:, :, k_]))
    out = out + db[None, :, None]
    y = jnp.transpose(out, (0, 2, 1))                                  # (B, W, HID)
    y = jnp.tanh(y @ params["l1_w"].T + params["l1_b"])
    return y @ params["l2_w"].T + params["l2_b"]


# ----------------------------------------------------------------------------
if __name__ == "__main__":
    key = jax.random.PRNGKey(0)
    key, kx = jax.random.split(key)
    x = jax.random.normal(kx, (BATCH, WINDOW), jnp.float32)
    params = init_params(key)

    slab = prepare_params(params)            # one-time layout prep (outside jit)
    fwd = jax.jit(transformer_forward)
    y = jax.block_until_ready(fwd(x, slab))

    y_ref = ref_forward(x, params)
    assert y.shape == (BATCH, WINDOW, OUT), y.shape
    max_err = float(jnp.max(jnp.abs(y - y_ref)))
    assert jnp.allclose(y, y_ref, atol=1e-4, rtol=1e-4), max_err

    print("KERNEL_OK")
</pallas_src>

<mosaic_0001>
module attributes {stable_mosaic.version = 11 : i64} {
  func.func @_transformer_kernel(%arg0: memref<16x6xf32, #tpu.memory_space<vmem>>, %arg1: memref<400x128xf32, #tpu.memory_space<vmem>>, %arg2: memref<32x5xf32, #tpu.memory_space<vmem>>) attributes {dimension_semantics = [], scalar_prefetch = 0 : i64, scratch_operands = 0 : i64, tpu.core_type = #tpu.core_type<tc>} {
    %c0 = arith.constant 0 : index
    %c0_0 = arith.constant 0 : index
    %0 = vector.load %arg0[%c0, %c0_0] : memref<16x6xf32, #tpu.memory_space<vmem>>, vector<16x6xf32>
    %c0_1 = arith.constant 0 : index
    %c0_2 = arith.constant 0 : index
    %1 = vector.load %arg1[%c0_1, %c0_2] : memref<400x128xf32, #tpu.memory_space<vmem>>, vector<6x8xf32>
    %cst = arith.constant dense<0.000000e+00> : vector<16x8xf32>
    %2 = tpu.matmul %0, %1, %cst {dimension_numbers = #tpu.dot_dimension_numbers<[1], [0], [0], [1], [0, 0, 1, 1], [], []>} : vector<16x6xf32>, vector<6x8xf32>, vector<16x8xf32> -> vector<16x8xf32>
    %c8 = arith.constant 8 : index
    %c0_3 = arith.constant 0 : index
    %3 = vector.load %arg1[%c8, %c0_3] : memref<400x128xf32, #tpu.memory_space<vmem>>, vector<1x8xf32>
    %4 = vector.broadcast %3 : vector<1x8xf32> to vector<16x8xf32>
    %5 = arith.addf %2, %4 : vector<16x8xf32>
    %6 = vector.extract_strided_slice %5 {offsets = [0, 0], sizes = [16, 4], strides = [1, 1]} : vector<16x8xf32> to vector<16x4xf32>
    %7 = vector.extract_strided_slice %5 {offsets = [0, 4], sizes = [16, 4], strides = [1, 1]} : vector<16x8xf32> to vector<16x4xf32>
    %8 = arith.mulf %6, %6 : vector<16x4xf32>
    %9 = arith.mulf %7, %7 : vector<16x4xf32>
    %10 = arith.addf %8, %9 : vector<16x4xf32>
    %11 = math.sqrt %10 : vector<16x4xf32>
    %c16 = arith.constant 16 : index
    %c0_4 = arith.constant 0 : index
    %12 = vector.load %arg1[%c16, %c0_4] : memref<400x128xf32, #tpu.memory_space<vmem>>, vector<16x4xf32>
    %13 = arith.addf %11, %12 : vector<16x4xf32>
    %c32 = arith.constant 32 : index
    %c0_5 = arith.constant 0 : index
    %14 = vector.load %arg1[%c32, %c0_5] : memref<400x128xf32, #tpu.memory_space<vmem>>, vector<1x4xf32>
    %c40 = arith.constant 40 : index
    %c0_6 = arith.constant 0 : index
    %15 = vector.load %arg1[%c40, %c0_6] : memref<400x128xf32, #tpu.memory_space<vmem>>, vector<1x4xf32>
    %cst_7 = arith.constant dense<0.000000e+00> : vector<16xf32>
    %16 = vector.multi_reduction <add>, %13, %cst_7 [1] : vector<16x4xf32> to vector<16xf32>
    %17 = vector.shape_cast %16 : vector<16xf32> to vector<16x1xf32>
    %cst_8 = arith.constant 4.000000e+00 : f32
    %18 = vector.broadcast %cst_8 : f32 to vector<16x1xf32>
    %19 = arith.divf %17, %18 : vector<16x1xf32>
    %20 = vector.broadcast %19 : vector<16x1xf32> to vector<16x4xf32>
    %21 = arith.subf %13, %20 : vector<16x4xf32>
    %22 = arith.mulf %21, %21 : vector<16x4xf32>
    %cst_9 = arith.constant dense<0.000000e+00> : vector<16xf32>
    %23 = vector.multi_reduction <add>, %22, %cst_9 [1] : vector<16x4xf32> to vector<16xf32>
    %24 = vector.shape_cast %23 : vector<16xf32> to vector<16x1xf32>
    %cst_10 = arith.constant 0.333333343 : f32
    %25 = vector.broadcast %cst_10 : f32 to vector<16x1xf32>
    %26 = arith.mulf %24, %25 : vector<16x1xf32>
    %27 = vector.broadcast %14 : vector<1x4xf32> to vector<16x4xf32>
    %28 = arith.mulf %27, %21 : vector<16x4xf32>
    %29 = math.sqrt %26 : vector<16x1xf32>
    %cst_11 = arith.constant 9.99999997E-7 : f32
    %30 = vector.broadcast %cst_11 : f32 to vector<16x1xf32>
    %31 = arith.addf %29, %30 : vector<16x1xf32>
    %32 = vector.broadcast %31 : vector<16x1xf32> to vector<16x4xf32>
    %33 = arith.divf %28, %32 : vector<16x4xf32>
    %34 = vector.broadcast %15 : vector<1x4xf32> to vector<16x4xf32>
    %35 = arith.addf %33, %34 : vector<16x4xf32>
    %c48 = arith.constant 48 : index
    %c0_12 = arith.constant 0 : index
    %36 = vector.load %arg1[%c48, %c0_12] : memref<400x128xf32, #tpu.memory_space<vmem>>, vector<4x12xf32>
    %cst_13 = arith.constant dense<0.000000e+00> : vector<16x12xf32>
    %37 = tpu.matmul %35, %36, %cst_13 {dimension_numbers = #tpu.dot_dimension_numbers<[1], [0], [0], [1], [0, 0, 1, 1], [], []>} : vector<16x4xf32>, vector<4x12xf32>, vector<16x12xf32> -> vector<16x12xf32>
    %c56 = arith.constant 56 : index
    %c0_14 = arith.constant 0 : index
    %38 = vector.load %arg1[%c56, %c0_14] : memref<400x128xf32, #tpu.memory_space<vmem>>, vector<1x12xf32>
    %39 = vector.broadcast %38 : vector<1x12xf32> to vector<16x12xf32>
    %40 = arith.addf %37, %39 : vector<16x12xf32>
    %41 = vector.extract_strided_slice %40 {offsets = [0, 0], sizes = [16, 4], strides = [1, 1]} : vector<16x12xf32> to vector<16x4xf32>
    %cst_15 = arith.constant 0.707106769 : f32
    %42 = vector.broadcast %cst_15 : f32 to vector<16x4xf32>
    %43 = arith.mulf %41, %42 : vector<16x4xf32>
    %44 = vector.extract_strided_slice %40 {offsets = [0, 4], sizes = [16, 4], strides = [1, 1]} : vector<16x12xf32> to vector<16x4xf32>
    %45 = vector.extract_strided_slice %40 {offsets = [0, 8], sizes = [16, 4], strides = [1, 1]} : vector<16x12xf32> to vector<16x4xf32>
    %c320 = arith.constant 320 : index
    %c0_16 = arith.constant 0 : index
    %46 = vector.load %arg1[%c320, %c0_16] : memref<400x128xf32, #tpu.memory_space<vmem>>, vector<32x4xf32>
    %47 = tpu.concatenate %44, %44 in 0 : vector<16x4xf32>, vector<16x4xf32> -> vector<32x4xf32>
    %48 = arith.mulf %47, %46 : vector<32x4xf32>
    %49 = tpu.concatenate %45, %45 in 0 : vector<16x4xf32>, vector<16x4xf32> -> vector<32x4xf32>
    %50 = arith.mulf %49, %46 : vector<32x4xf32>
    %cst_17 = arith.constant dense<0.000000e+00> : vector<16x32xf32>
    %51 = tpu.matmul %43, %48, %cst_17 {dimension_numbers = #tpu.dot_dimension_numbers<[1], [1], [0], [0], [0, 0, 1, 0], [], []>} : vector<16x4xf32>, vector<32x4xf32>, vector<16x32xf32> -> vector<16x32xf32>
    %c352 = arith.constant 352 : index
    %c0_18 = arith.constant 0 : index
    %52 = vector.load %arg1[%c352, %c0_18] : memref<400x128xf32, #tpu.memory_space<vmem>>, vector<16x32xf32>
    %53 = arith.addf %51, %52 : vector<16x32xf32>
    %54 = vector.extract_strided_slice %53 {offsets = [0, 0], sizes = [16, 16], strides = [1, 1]} : vector<16x32xf32> to vector<16x16xf32>
    %55 = vector.extract_strided_slice %53 {offsets = [0, 16], sizes = [16, 16], strides = [1, 1]} : vector<16x32xf32> to vector<16x16xf32>
    %cst_19 = arith.constant dense<0xFF800000> : vector<16xf32>
    %56 = vector.multi_reduction <maximumf>, %54, %cst_19 [1] : vector<16x16xf32> to vector<16xf32>
    %57 = vector.shape_cast %56 : vector<16xf32> to vector<16x1xf32>
    %58 = vector.broadcast %57 : vector<16x1xf32> to vector<16x16xf32>
    %59 = arith.subf %54, %58 : vector<16x16xf32>
    %60 = math.exp %59 : vector<16x16xf32>
    %cst_20 = arith.constant dense<0xFF800000> : vector<16xf32>
    %61 = vector.multi_reduction <maximumf>, %55, %cst_20 [1] : vector<16x16xf32> to vector<16xf32>
    %62 = vector.shape_cast %61 : vector<16xf32> to vector<16x1xf32>
    %63 = vector.broadcast %62 : vector<16x1xf32> to vector<16x16xf32>
    %64 = arith.subf %55, %63 : vector<16x16xf32>
    %65 = math.exp %64 : vector<16x16xf32>
    %cst_21 = arith.constant dense<0.000000e+00> : vector<16xf32>
    %66 = vector.multi_reduction <add>, %60, %cst_21 [1] : vector<16x16xf32> to vector<16xf32>
    %67 = vector.shape_cast %66 : vector<16xf32> to vector<16x1xf32>
    %68 = tpu.reciprocal %67 {approx = true} : vector<16x1xf32> -> vector<16x1xf32>
    %69 = vector.broadcast %68 : vector<16x1xf32> to vector<16x16xf32>
    %70 = arith.mulf %60, %69 : vector<16x16xf32>
    %cst_22 = arith.constant dense<0.000000e+00> : vector<16xf32>
    %71 = vector.multi_reduction <add>, %65, %cst_22 [1] : vector<16x16xf32> to vector<16xf32>
    %72 = vector.shape_cast %71 : vector<16xf32> to vector<16x1xf32>
    %73 = tpu.reciprocal %72 {approx = true} : vector<16x1xf32> -> vector<16x1xf32>
    %74 = vector.broadcast %73 : vector<16x1xf32> to vector<16x16xf32>
    %75 = arith.mulf %65, %74 : vector<16x16xf32>
    %76 = tpu.concatenate %70, %75 in 1 : vector<16x16xf32>, vector<16x16xf32> -> vector<16x32xf32>
    %cst_23 = arith.constant dense<0.000000e+00> : vector<16x4xf32>
    %77 = tpu.matmul %76, %50, %cst_23 {dimension_numbers = #tpu.dot_dimension_numbers<[1], [0], [0], [1], [0, 0, 1, 1], [], []>} : vector<16x32xf32>, vector<32x4xf32>, vector<16x4xf32> -> vector<16x4xf32>
    %c64 = arith.constant 64 : index
    %c0_24 = arith.constant 0 : index
    %78 = vector.load %arg1[%c64, %c0_24] : memref<400x128xf32, #tpu.memory_space<vmem>>, vector<4x4xf32>
    %cst_25 = arith.constant dense<0.000000e+00> : vector<16x4xf32>
    %79 = tpu.matmul %77, %78, %cst_25 {dimension_numbers = #tpu.dot_dimension_numbers<[1], [0], [0], [1], [0, 0, 1, 1], [], []>} : vector<16x4xf32>, vector<4x4xf32>, vector<16x4xf32> -> vector<16x4xf32>
    %c72 = arith.constant 72 : index
    %c0_26 = arith.constant 0 : index
    %80 = vector.load %arg1[%c72, %c0_26] : memref<400x128xf32, #tpu.memory_space<vmem>>, vector<1x4xf32>
    %81 = vector.broadcast %80 : vector<1x4xf32> to vector<16x4xf32>
    %82 = arith.addf %79, %81 : vector<16x4xf32>
    %83 = arith.addf %35, %82 : vector<16x4xf32>
    %c80 = arith.constant 80 : index
    %c0_27 = arith.constant 0 : index
    %84 = vector.load %arg1[%c80, %c0_27] : memref<400x128xf32, #tpu.memory_space<vmem>>, vector<1x4xf32>
    %c88 = arith.constant 88 : index
    %c0_28 = arith.constant 0 : index
    %85 = vector.load %arg1[%c88, %c0_28] : memref<400x128xf32, #tpu.memory_space<vmem>>, vector<1x4xf32>
    %cst_29 = arith.constant dense<0.000000e+00> : vector<16xf32>
    %86 = vector.multi_reduction <add>, %83, %cst_29 [1] : vector<16x4xf32> to vector<16xf32>
    %87 = vector.shape_cast %86 : vector<16xf32> to vector<16x1xf32>
    %cst_30 = arith.constant 4.000000e+00 : f32
    %88 = vector.broadcast %cst_30 : f32 to vector<16x1xf32>
    %89 = arith.divf %87, %88 : vector<16x1xf32>
    %90 = vector.broadcast %89 : vector<16x1xf32> to vector<16x4xf32>
    %91 = arith.subf %83, %90 : vector<16x4xf32>
    %92 = arith.mulf %91, %91 : vector<16x4xf32>
    %cst_31 = arith.constant dense<0.000000e+00> : vector<16xf32>
    %93 = vector.multi_reduction <add>, %92, %cst_31 [1] : vector<16x4xf32> to vector<16xf32>
    %94 = vector.shape_cast %93 : vector<16xf32> to vector<16x1xf32>
    %cst_32 = arith.constant 0.333333343 : f32
    %95 = vector.broadcast %cst_32 : f32 to vector<16x1xf32>
    %96 = arith.mulf %94, %95 : vector<16x1xf32>
    %97 = vector.broadcast %84 : vector<1x4xf32> to vector<16x4xf32>
    %98 = arith.mulf %97, %91 : vector<16x4xf32>
    %99 = math.sqrt %96 : vector<16x1xf32>
    %cst_33 = arith.constant 9.99999997E-7 : f32
    %100 = vector.broadcast %cst_33 : f32 to vector<16x1xf32>
    %101 = arith.addf %99, %100 : vector<16x1xf32>
    %102 = vector.broadcast %101 : vector<16x1xf32> to vector<16x4xf32>
    %103 = arith.divf %98, %102 : vector<16x4xf32>
    %104 = vector.broadcast %85 : vector<1x4xf32> to vector<16x4xf32>
    %105 = arith.addf %103, %104 : vector<16x4xf32>
    %c96 = arith.constant 96 : index
    %c0_34 = arith.constant 0 : index
    %106 = vector.load %arg1[%c96, %c0_34] : memref<400x128xf32, #tpu.memory_space<vmem>>, vector<4x16xf32>
    %cst_35 = arith.constant dense<0.000000e+00> : vector<16x16xf32>
    %107 = tpu.matmul %105, %106, %cst_35 {dimension_numbers = #tpu.dot_dimension_numbers<[1], [0], [0], [1], [0, 0, 1, 1], [], []>} : vector<16x4xf32>, vector<4x16xf32>, vector<16x16xf32> -> vector<16x16xf32>
    %c104 = arith.constant 104 : index
    %c0_36 = arith.constant 0 : index
    %108 = vector.load %arg1[%c104, %c0_36] : memref<400x128xf32, #tpu.memory_space<vmem>>, vector<1x16xf32>
    %109 = vector.broadcast %108 : vector<1x16xf32> to vector<16x16xf32>
    %110 = arith.addf %107, %109 : vector<16x16xf32>
    %cst_37 = arith.constant 5.000000e-01 : f32
    %111 = vector.broadcast %cst_37 : f32 to vector<16x16xf32>
    %112 = arith.mulf %111, %110 : vector<16x16xf32>
    %cst_38 = arith.constant 4.471500e-02 : f32
    %113 = vector.broadcast %cst_38 : f32 to vector<16x16xf32>
    %114 = arith.mulf %113, %110 : vector<16x16xf32>
    %115 = arith.mulf %114, %110 : vector<16x16xf32>
    %116 = arith.mulf %115, %110 : vector<16x16xf32>
    %117 = arith.addf %110, %116 : vector<16x16xf32>
    %cst_39 = arith.constant 0.797884583 : f32
    %118 = vector.broadcast %cst_39 : f32 to vector<16x16xf32>
    %119 = arith.mulf %118, %117 : vector<16x16xf32>
    %120 = math.tanh %119 : vector<16x16xf32>
    %cst_40 = arith.constant 1.000000e+00 : f32
    %121 = vector.broadcast %cst_40 : f32 to vector<16x16xf32>
    %122 = arith.addf %121, %120 : vector<16x16xf32>
    %123 = arith.mulf %112, %122 : vector<16x16xf32>
    %c112 = arith.constant 112 : index
    %c0_41 = arith.constant 0 : index
    %124 = vector.load %arg1[%c112, %c0_41] : memref<400x128xf32, #tpu.memory_space<vmem>>, vector<16x4xf32>
    %cst_42 = arith.constant dense<0.000000e+00> : vector<16x4xf32>
    %125 = tpu.matmul %123, %124, %cst_42 {dimension_numbers = #tpu.dot_dimension_numbers<[1], [0], [0], [1], [0, 0, 1, 1], [], []>} : vector<16x16xf32>, vector<16x4xf32>, vector<16x4xf32> -> vector<16x4xf32>
    %c128 = arith.constant 128 : index
    %c0_43 = arith.constant 0 : index
    %126 = vector.load %arg1[%c128, %c0_43] : memref<400x128xf32, #tpu.memory_space<vmem>>, vector<1x4xf32>
    %127 = vector.broadcast %126 : vector<1x4xf32> to vector<16x4xf32>
    %128 = arith.addf %125, %127 : vector<16x4xf32>
    %129 = arith.addf %105, %128 : vector<16x4xf32>
    %c136 = arith.constant 136 : index
    %c0_44 = arith.constant 0 : index
    %130 = vector.load %arg1[%c136, %c0_44] : memref<400x128xf32, #tpu.memory_space<vmem>>, vector<1x4xf32>
    %c144 = arith.constant 144 : index
    %c0_45 = arith.constant 0 : index
    %131 = vector.load %arg1[%c144, %c0_45] : memref<400x128xf32, #tpu.memory_space<vmem>>, vector<1x4xf32>
    %cst_46 = arith.constant dense<0.000000e+00> : vector<16xf32>
    %132 = vector.multi_reduction <add>, %129, %cst_46 [1] : vector<16x4xf32> to vector<16xf32>
    %133 = vector.shape_cast %132 : vector<16xf32> to vector<16x1xf32>
    %cst_47 = arith.constant 4.000000e+00 : f32
    %134 = vector.broadcast %cst_47 : f32 to vector<16x1xf32>
    %135 = arith.divf %133, %134 : vector<16x1xf32>
    %136 = vector.broadcast %135 : vector<16x1xf32> to vector<16x4xf32>
    %137 = arith.subf %129, %136 : vector<16x4xf32>
    %138 = arith.mulf %137, %137 : vector<16x4xf32>
    %cst_48 = arith.constant dense<0.000000e+00> : vector<16xf32>
    %139 = vector.multi_reduction <add>, %138, %cst_48 [1] : vector<16x4xf32> to vector<16xf32>
    %140 = vector.shape_cast %139 : vector<16xf32> to vector<16x1xf32>
    %cst_49 = arith.constant 0.333333343 : f32
    %141 = vector.broadcast %cst_49 : f32 to vector<16x1xf32>
    %142 = arith.mulf %140, %141 : vector<16x1xf32>
    %143 = vector.broadcast %130 : vector<1x4xf32> to vector<16x4xf32>
    %144 = arith.mulf %143, %137 : vector<16x4xf32>
    %145 = math.sqrt %142 : vector<16x1xf32>
    %cst_50 = arith.constant 9.99999997E-7 : f32
    %146 = vector.broadcast %cst_50 : f32 to vector<16x1xf32>
    %147 = arith.addf %145, %146 : vector<16x1xf32>
    %148 = vector.broadcast %147 : vector<16x1xf32> to vector<16x4xf32>
    %149 = arith.divf %144, %148 : vector<16x4xf32>
    %150 = vector.broadcast %131 : vector<1x4xf32> to vector<16x4xf32>
    %151 = arith.addf %149, %150 : vector<16x4xf32>
    %c152 = arith.constant 152 : index
    %c0_51 = arith.constant 0 : index
    %152 = vector.load %arg1[%c152, %c0_51] : memref<400x128xf32, #tpu.memory_space<vmem>>, vector<4x16xf32>
    %cst_52 = arith.constant dense<0.000000e+00> : vector<16x16xf32>
    %153 = tpu.matmul %151, %152, %cst_52 {dimension_numbers = #tpu.dot_dimension_numbers<[1], [0], [0], [1], [0, 0, 1, 1], [], []>} : vector<16x4xf32>, vector<4x16xf32>, vector<16x16xf32> -> vector<16x16xf32>
    %154 = vector.extract_strided_slice %153 {offsets = [0, 0], sizes = [16, 4], strides = [1, 1]} : vector<16x16xf32> to vector<16x4xf32>
    %155 = vector.extract_strided_slice %153 {offsets = [0, 4], sizes = [16, 4], strides = [1, 1]} : vector<16x16xf32> to vector<16x4xf32>
    %156 = vector.extract_strided_slice %153 {offsets = [0, 8], sizes = [16, 4], strides = [1, 1]} : vector<16x16xf32> to vector<16x4xf32>
    %157 = vector.extract_strided_slice %153 {offsets = [0, 12], sizes = [16, 4], strides = [1, 1]} : vector<16x16xf32> to vector<16x4xf32>
    %c368 = arith.constant 368 : index
    %c0_53 = arith.constant 0 : index
    %158 = vector.load %arg1[%c368, %c0_53] : memref<400x128xf32, #tpu.memory_space<vmem>>, vector<32x32xf32>
    %159 = tpu.concatenate %155, %157 in 0 : vector<16x4xf32>, vector<16x4xf32> -> vector<32x4xf32>
    %cst_54 = arith.constant dense<0.000000e+00> : vector<32x4xf32>
    %160 = tpu.matmul %158, %159, %cst_54 {dimension_numbers = #tpu.dot_dimension_numbers<[1], [0], [0], [1], [0, 0, 1, 1], [], []>} : vector<32x32xf32>, vector<32x4xf32>, vector<32x4xf32> -> vector<32x4xf32>
    %161 = tpu.concatenate %154, %156 in 0 : vector<16x4xf32>, vector<16x4xf32> -> vector<32x4xf32>
    %162 = arith.addf %161, %160 : vector<32x4xf32>
    %c160 = arith.constant 160 : index
    %c0_55 = arith.constant 0 : index
    %163 = vector.load %arg1[%c160, %c0_55] : memref<400x128xf32, #tpu.memory_space<vmem>>, vector<1x4xf32>
    %164 = vector.broadcast %163 : vector<1x4xf32> to vector<32x4xf32>
    %165 = arith.addf %162, %164 : vector<32x4xf32>
    %c168 = arith.constant 168 : index
    %c0_56 = arith.constant 0 : index
    %166 = vector.load %arg1[%c168, %c0_56] : memref<400x128xf32, #tpu.memory_space<vmem>>, vector<4x128xf32>
    %cst_57 = arith.constant dense<0.000000e+00> : vector<32x128xf32>
    %167 = tpu.matmul %165, %166, %cst_57 {dimension_numbers = #tpu.dot_dimension_numbers<[1], [0], [0], [1], [0, 0, 1, 1], [], []>} : vector<32x4xf32>, vector<4x128xf32>, vector<32x128xf32> -> vector<32x128xf32>
    %c176 = arith.constant 176 : index
    %c0_58 = arith.constant 0 : index
    %168 = vector.load %arg1[%c176, %c0_58] : memref<400x128xf32, #tpu.memory_space<vmem>>, vector<1x128xf32>
    %169 = vector.broadcast %168 : vector<1x128xf32> to vector<32x128xf32>
    %170 = arith.addf %167, %169 : vector<32x128xf32>
    %171 = math.tanh %170 : vector<32x128xf32>
    %c184 = arith.constant 184 : index
    %c0_59 = arith.constant 0 : index
    %172 = vector.load %arg1[%c184, %c0_59] : memref<400x128xf32, #tpu.memory_space<vmem>>, vector<128x5xf32>
    %cst_60 = arith.constant dense<0.000000e+00> : vector<32x5xf32>
    %173 = tpu.matmul %171, %172, %cst_60 {dimension_numbers = #tpu.dot_dimension_numbers<[1], [0], [0], [1], [0, 0, 1, 1], [], []>} : vector<32x128xf32>, vector<128x5xf32>, vector<32x5xf32> -> vector<32x5xf32>
    %c312 = arith.constant 312 : index
    %c0_61 = arith.constant 0 : index
    %174 = vector.load %arg1[%c312, %c0_61] : memref<400x128xf32, #tpu.memory_space<vmem>>, vector<1x5xf32>
    %175 = vector.broadcast %174 : vector<1x5xf32> to vector<32x5xf32>
    %176 = arith.addf %173, %175 : vector<32x5xf32>
    %c0_62 = arith.constant 0 : index
    %c0_63 = arith.constant 0 : index
    %177 = vector.load %arg2[%c0_62, %c0_63] : memref<32x5xf32, #tpu.memory_space<vmem>>, vector<32x5xf32>
    tpu.vector_store %arg2[%c0_62, %c0_63], %176 {strides = array<i32>} : memref<32x5xf32, #tpu.memory_space<vmem>>, vector<32x5xf32>,
    return
  }
}

</mosaic_0001>

<bundles_post_ra>
// kernel: transformer_forward.1
= control target key start
LH: loop header
LB: loop body
LE: loop exit
PB: predicated region body
PF: predicated region fallthrough
CT: control target
= control target key end

     0   :  { %7 = vsyncpa [#allocation3], 0  ;;  %s1749_s9 = smov [#allocation2]   ;;  %s1919_s0 = inlined_call_operand.vmem [shape: f32[16,6], index: 0, kind: input, shape index: {}]   ;;  %s1920_s1 = inlined_call_operand.hbm [shape: f32[400,128], index: 1, kind: input, shape index: {}]   ;;  %s1921_s2 = inlined_call_operand.vmem [shape: f32[32,5], index: 2, kind: output, shape index: {}]  }
   0x1   :  { %s15_s10 = sshll.u32 %s1749_s9, 4  ;;  %s16_s10 = int_to_ptr.vmem [resolvable:$true] %s15_s10 }
   0x2   :  { %s1735_s11 = scalar_lea.vmem %s16_s10, 6400  ;;  %p1740_p1 = scmp.lt.s32.totalorder %s16_s10, %s16_s10 }
   0x3   :  { %p1736_p0 = scmp.ne.s32.totalorder %s16_s10, %s1735_s11  ;;  %p1741_p2 = scmp.lt.s32.totalorder %s1735_s11, %s1735_s11 }
   0x5   :  { %p1742_p3 = por %p1741_p2, %p1740_p1 }
   0x7   :  { %p1743_p4 = pnand %p1742_p3, %p1736_p0 }
   0x9   :  { %1746 = shalt.err (!%p1743_p4)
}
   0xa   :  { %s1750_s12 = smov 128   ;;  %s1751_s13 = smov 8  }
   0xb   :  { %21 = dma.hbm_to_vmem [thread:$0]  %s1920_s1, 6400, %s16_s10, [#allocation3], %s1750_s12, %s1750_s12, %s1751_s13  }
   0xc   :  { %1747 = dma.done.wait [#allocation3], 6400  }
   0xd   :  { %1748 = vsyncadd [#allocation3], 4294960896  ;;  %vm40_vm0 = vcmask 1045504   ;;  %vm33_vm1 = vcmask 48128   ;;  %v27_v0 = vld [vmem:[#allocation2] sm:$0x3f] }
   0xe   :  { %v25_v1 = vld [vmem:[%s1919_s0] sm:$0xff]  ;;  %v26_v2 = vld [vmem:[%s1919_s0 + $0x8] sm:$0xff]  ;;  %1550 = vmatprep.subr.msk.mxu0 %vm40_vm0, %v27_v0  ;;  %s1752_s1 = smov 124   ;;  %v145_v17 = vld [vmem:[#allocation2 + $0x10] sm:$0xff]  ;;  %vm151_vm4 = vcmask 31744   ;;  %vm217_vm7 = vcmask 1043456  }
   0xf   :  { %1552 = vmatprep.mubr.msk.f32.mxu0 %vm33_vm1, %v25_v1  ;;  %1551 = vmatpush3.msk.msra.mxu0 %vm40_vm0, %v27_v0  ;;  %v1438_v4 = vld [vmem:[#allocation2 + $0x8] ss:$0 sm:$0xff]  ;;  %v146_v24 = vld [vmem:[#allocation2 + $0x18] sm:$0xff]  ;;  %v205_v40 = vld [vmem:[#allocation2 + $0x30] sm:$0xf]  ;;  %s1753_s0 = smov 4  }
  0x10   :  { %1553 = vmatmul.mubr.msk.f32.vlgmr.msra.gmra.mxu0 %vm33_vm1, %v26_v2  ;;  %1555 = vmatprep.subr.msk.mxu0 %vm217_vm7, %v205_v40  ;;  %v1789_v41 = vld [vmem:[#allocation2 + $0x158] sm:$0xff]  ;;  %v1792_v42 = vld [vmem:[#allocation2 + $0x150] sm:$0xff]  ;;  %v1795_v43 = vld [vmem:[#allocation2 + $0x148] sm:$0xff]  ;;  %vm454_vm12 = vcmask 261248   ;;  %vm441_vm13 = vcmask 130048   ;;  %s1754_s20 = smov 112  }
  0x11   :  { %1556 = vmatpush3.msk.msra.mxu0 %vm217_vm7, %v205_v40  ;;  %v1798_v44 = vld [vmem:[#allocation2 + $0x140] sm:$0xff]  ;;  %v1443_v0 = vld [vmem:[#allocation2 + $0x28] ss:$0 sm:$0xff]  ;;  %s1755_s21 = smov 120   ;;  %vm513_vm14 = vcmask 261120  }
  0x12   :  { %v1442_v61 = vld [vmem:[#allocation2 + $0x20] ss:$0 sm:$0xff] }
  0xd0   :  { %v1554_v3 = vpop.f32.mrf.mxu0 }
  0xd1   :  { %v116_v7 = vadd.f32 %v1554_v3, %v1438_v4 }
  0xd2   :  { %v110_v5 = vpop.f32.mrf.mxu0 }
  0xd3   :  { %v111_v6 = vadd.f32 %v1438_v4, %v110_v5  ;;  %v120_v9 = vmul.f32 %v116_v7, %v116_v7 }
  0xd5   :  { %v119_v8 = vmul.f32 %v111_v6, %v111_v6 }
  0xd7   :  { %123 = vrot.lane.b32.xlu0 %v119_v8, %s1752_s1 }
  0xdb   :  { %125 = vrot.lane.b32.xlu0 %v120_v9, %s1752_s1 }
 0x149   :  { %v124_v10 = vpop.permute.xlu0 %123 }
 0x14a   :  { %v129_v11 = vadd.f32 %v124_v10, %v119_v8 }
 0x14c   :  { %1671 = vrsqrt.f32 %v129_v11  ;;  %vm133_vm2 = vcmp.eq.f32.partialorder %v129_v11, inf  ;;  %v136_v16 = vand.u32 2147483648, %v129_v11  ;;  %vm135_vm3 = vcmp.eq.f32.partialorder %v129_v11, 0.0 }
 0x14d   :  { %v126_v12 = vpop.permute.xlu0 %125 }
 0x14e   :  { %v130_v13 = vadd.f32 %v126_v12, %v120_v9  ;;  %v1444_v9 = vld [vmem:[#allocation2 + $0x38] ss:$0 sm:$0xff] }
 0x150   :  { %1673 = vrsqrt.f32 %v130_v13  ;;  %vm140_vm5 = vcmp.eq.f32.partialorder %v130_v13, inf  ;;  %v143_v23 = vand.u32 2147483648, %v130_v13  ;;  %vm142_vm6 = vcmp.eq.f32.partialorder %v130_v13, 0.0 }
 0x159   :  { %v1672_v14 = vpop.eup %1671 }
 0x15a   :  { %v132_v15 = vmul.f32 %v1672_v14, %v129_v11 }
 0x15c   :  { %v134_v18 = vsel %vm133_vm2, %v129_v11, %v132_v15 }
 0x15d   :  { %v1674_v19 = vpop.eup %1673  ;;  %v137_v20 = vsel %vm135_vm3, %v136_v16, %v134_v18 }
 0x15e   :  { %v147_v21 = vadd.f32 %v145_v17, %v137_v20  ;;  %v139_v22 = vmul.f32 %v1674_v19, %v130_v13 }
 0x160   :  { %v152_v25 = vsel %vm151_vm4, %v147_v21, 0.0  ;;  %v141_v26 = vsel %vm140_vm5, %v130_v13, %v139_v22 }
 0x161   :  { %153 = vadd.xlane.f32.xlu1 %v152_v25  ;;  %v144_v27 = vsel %vm142_vm6, %v143_v23, %v141_v26  ;;  %v339_v26 = vld [vmem:[#allocation2 + $0x168] sm:$0xff] }
 0x162   :  { %v148_v28 = vadd.f32 %v146_v24, %v144_v27 }
 0x164   :  { %v155_v29 = vsel %vm151_vm4, %v148_v28, 0.0 }
 0x165   :  { %156 = vadd.xlane.f32.xlu1 %v155_v29 }
 0x1ea   :  { %v154_v30 = vpop.xlane.xlu1 %153 }
 0x1eb   :  { %v159_v31 = vmul.f32 0.25, %v154_v30 }
 0x1ed   :  { %v161_v32 = vsub.f32 %v147_v21, %v159_v31 }
 0x1ee   :  { %v157_v33 = vpop.xlane.xlu1 %156 }
 0x1ef   :  { %v160_v34 = vmul.f32 0.25, %v157_v33  ;;  %v163_v35 = vmul.f32 %v161_v32, %v161_v32  ;;  %v177_v62 = vmul.f32 %v1442_v61, %v161_v32 }
 0x1f1   :  { %v162_v36 = vsub.f32 %v148_v28, %v160_v34  ;;  %v165_v37 = vsel %vm151_vm4, %v163_v35, 0.0  ;;  %v338_v28 = vld [vmem:[#allocation2 + $0x160] sm:$0xff] }
 0x1f2   :  { %166 = vadd.xlane.f32.xlu0 %v165_v37 }
 0x1f3   :  { %v164_v38 = vmul.f32 %v162_v36, %v162_v36  ;;  %v178_v2 = vmul.f32 %v1442_v61, %v162_v36 }
 0x1f5   :  { %v168_v39 = vsel %vm151_vm4, %v164_v38, 0.0 }
 0x1f6   :  { %169 = vadd.xlane.f32.xlu1 %v168_v39 }
 0x207   :  { %312 = vrot.lane.b32.xlu1 %v1789_v41, %s1753_s0 }
 0x20b   :  { %310 = vrot.lane.b32.xlu1 %v1792_v42, %s1753_s0 }
 0x20f   :  { %308 = vrot.lane.b32.xlu1 %v1795_v43, %s1753_s0 }
 0x213   :  { %306 = vrot.lane.b32.xlu1 %v1798_v44, %s1753_s0 }
 0x27b   :  { %v167_v45 = vpop.xlane.xlu0 %166 }
 0x27c   :  { %v171_v46 = vmul.f32 0.33333334, %v167_v45 }
 0x27e   :  { %1675 = vrsqrt.f32 %v171_v46  ;;  %vm181_vm8 = vcmp.eq.f32.partialorder %v171_v46, inf  ;;  %v184_v51 = vand.u32 2147483648, %v171_v46  ;;  %vm183_vm9 = vcmp.eq.f32.partialorder %v171_v46, 0.0 }
 0x27f   :  { %v170_v47 = vpop.xlane.xlu1 %169 }
 0x280   :  { %v172_v48 = vmul.f32 0.33333334, %v170_v47 }
 0x282   :  { %1677 = vrsqrt.f32 %v172_v48  ;;  %vm188_vm10 = vcmp.eq.f32.partialorder %v172_v48, inf  ;;  %v191_v57 = vand.u32 2147483648, %v172_v48  ;;  %vm190_vm11 = vcmp.eq.f32.partialorder %v172_v48, 0.0 }
 0x283   :  { %v313_v7 = vpop.permute.xlu1 %312 }
 0x287   :  { %v311_v8 = vpop.permute.xlu1 %310 }
 0x28b   :  { %v1676_v49 = vpop.eup %1675  ;;  %v309_v15 = vpop.permute.xlu1 %308 }
 0x28c   :  { %v180_v50 = vmul.f32 %v1676_v49, %v171_v46 }
 0x28e   :  { %v182_v52 = vsel %vm181_vm8, %v171_v46, %v180_v50 }
 0x28f   :  { %v1678_v53 = vpop.eup %1677  ;;  %v185_v54 = vsel %vm183_vm9, %v184_v51, %v182_v52  ;;  %v307_v19 = vpop.permute.xlu1 %306 }
 0x290   :  { %v193_v55 = vadd.f32 1e-06, %v185_v54  ;;  %v187_v56 = vmul.f32 %v1678_v53, %v172_v48 }
 0x292   :  { %1679 = vrcp.f32 %v193_v55  ;;  %v189_v58 = vsel %vm188_vm10, %v172_v48, %v187_v56 }
 0x293   :  { %v192_v59 = vsel %vm190_vm11, %v191_v57, %v189_v58 }
 0x294   :  { %v194_v60 = vadd.f32 1e-06, %v192_v59 }
 0x296   :  { %1681 = vrcp.f32 %v194_v60 }
 0x29f   :  { %v1680_v63 = vpop.eup %1679 }
 0x2a0   :  { %v196_v1 = vmul.f32 %v1680_v63, %v177_v62 }
 0x2a2   :  { %v1801_v3 = vadd.f32 %v1443_v0, %v196_v1 }
 0x2a3   :  { %v1682_v4 = vpop.eup %1681 }
 0x2a4   :  { %v198_v5 = vmul.f32 %v1682_v4, %v178_v2  ;;  %1557 = vmatprep.mubr.msk.f32.mxu0 %vm151_vm4, %v1801_v3 }
 0x2a6   :  { %v1805_v6 = vadd.f32 %v1443_v0, %v198_v5 }
 0x2a8   :  { %1558 = vmatmul.mubr.msk.f32.vlgmr.msra.gmra.mxu0 %vm151_vm4, %v1805_v6 }
 0x368   :  { %v1559_v10 = vpop.f32.mrf.mxu0 }
 0x369   :  { %v1809_v11 = vadd.f32 %v1559_v10, %v1444_v9 }
 0x36a   :  { %v287_v12 = vpop.f32.mrf.mxu0 }
 0x36b   :  { %v1811_v13 = vadd.f32 %v1444_v9, %v287_v12  ;;  %v321_v14 = vmul.f32 %v313_v7, %v1809_v11  ;;  %v319_v18 = vmul.f32 %v309_v15, %v1809_v11  ;;  %v297_v25 = vmul.f32 0.70710677, %v1809_v11 }
 0x36d   :  { %350 = vrot.lane.b32.xlu0 %v321_v14, %s1752_s1  ;;  %v320_v16 = vmul.f32 %v311_v8, %v1811_v13  ;;  %v296_v17 = vmul.f32 0.70710677, %v1811_v13  ;;  %v318_v20 = vmul.f32 %v307_v19, %v1811_v13 }
 0x36f   :  { %348 = vrot.lane.b32.xlu1 %v320_v16, %s1752_s1  ;;  %1568 = vmatprep.mubr.msk.f32.mxu0 %vm151_vm4, %v296_v17 }
 0x373   :  { %346 = vrot.lane.b32.xlu1 %v319_v18, %s1752_s1 }
 0x377   :  { %344 = vrot.lane.b32.xlu1 %v318_v20, %s1752_s1 }
 0x3df   :  { %v351_v21 = vpop.permute.xlu0 %350 }
 0x3e0   :  { %1560 = vmatprep.subr.msk.mxu0 %vm151_vm4, %v351_v21 }
 0x3e1   :  { %1561 = vmatpush3.xpose.msk.msra.mxu0 %vm151_vm4, %v351_v21  ;;  %v349_v22 = vpop.permute.xlu1 %348 }
 0x3e2   :  { %1562 = vmatprep.subr.msk.mxu0 %vm151_vm4, %v349_v22 }
 0x3e5   :  { %1563 = vmatpush3.xpose.msk.msra.mxu0 %vm151_vm4, %v349_v22  ;;  %v347_v23 = vpop.permute.xlu1 %346  ;;  %v595_v22 = vld [vmem:[#allocation2 + $0x40] sm:$0xf] }
 0x3e6   :  { %1564 = vmatprep.subr.msk.mxu0 %vm151_vm4, %v347_v23  ;;  %1582 = vmatprep.subr.msk.mxu1 %vm217_vm7, %v595_v22 }
 0x3e7   :  { %1583 = vmatpush3.msk.msra.mxu1 %vm217_vm7, %v595_v22 }
 0x3e9   :  { %1565 = vmatpush3.xpose.msk.msra.mxu0 %vm151_vm4, %v347_v23  ;;  %v345_v24 = vpop.permute.xlu1 %344 }
 0x3ea   :  { %1566 = vmatprep.subr.msk.mxu0 %vm151_vm4, %v345_v24 }
 0x3ed   :  { %1567 = vmatpush3.xpose.msk.msra.mxu0 %vm151_vm4, %v345_v24 }
 0x3f0   :  { %1569 = vmatmul.mubr.msk.f32.vlgmr.msra.gmra.mxu0 %vm151_vm4, %v297_v25  ;;  %v1456_v25 = vld [vmem:[#allocation2 + $0x48] ss:$0 sm:$0xff] }
 0x4b0   :  { %v1570_v27 = vpop.f32.mrf.mxu0 }
 0x4b1   :  { %v438_v29 = vadd.f32 %v1570_v27, %v339_v26 }
 0x4b2   :  { %v432_v30 = vpop.f32.mrf.mxu0 }
 0x4b3   :  { %v433_v31 = vadd.f32 %v432_v30, %v338_v28  ;;  %v458_v32 = vsel %vm454_vm12, %v438_v29, -inf  ;;  %v445_v34 = vsel %vm441_vm13, %v438_v29, -inf }
 0x4b4   :  { %459 = vmax.xlane.f32.xlu0 %v458_v32 }
 0x4b5   :  { %v455_v33 = vsel %vm454_vm12, %v433_v31, -inf  ;;  %v442_v35 = vsel %vm441_vm13, %v433_v31, -inf }
 0x4b6   :  { %456 = vmax.xlane.f32.xlu1 %v455_v33 }
 0x4b8   :  { %446 = vmax.xlane.f32.xlu0 %v445_v34 }
 0x4ba   :  { %443 = vmax.xlane.f32.xlu1 %v442_v35 }
 0x53d   :  { %v460_v36 = vpop.xlane.xlu0 %459 }
 0x53e   :  { %v462_v37 = vsub.f32 %v438_v29, %v460_v36 }
 0x53f   :  { %v457_v38 = vpop.xlane.xlu1 %456 }
 0x540   :  { %v465_v39 = vmul.f32 1.442695, %v462_v37  ;;  %v461_v40 = vsub.f32 %v433_v31, %v457_v38 }
 0x541   :  { %v447_v48 = vpop.xlane.xlu0 %446 }
 0x542   :  { %1683 = vpow2.f32 %v465_v39  ;;  %v463_v45 = vmul.f32 1.442695, %v461_v40  ;;  %v449_v49 = vsub.f32 %v438_v29, %v447_v48 }
 0x543   :  { %v444_v50 = vpop.xlane.xlu1 %443 }
 0x544   :  { %1685 = vpow2.f32 %v463_v45  ;;  %v452_v51 = vmul.f32 1.442695, %v449_v49  ;;  %v448_v52 = vsub.f32 %v433_v31, %v444_v50 }
 0x546   :  { %1687 = vpow2.f32 %v452_v51  ;;  %v450_v53 = vmul.f32 1.442695, %v448_v52 }
 0x548   :  { %1689 = vpow2.f32 %v450_v53 }
 0x54f   :  { %v1835_v46 = vpop.eup %1683 }
 0x550   :  { %481 = vrot.lane.b32.xlu0 %v1835_v46, %s1754_s20 }
 0x551   :  { %v1838_v47 = vpop.eup %1685 }
 0x552   :  { %479 = vrot.lane.b32.xlu1 %v1838_v47, %s1754_s20 }
 0x553   :  { %v1688_v54 = vpop.eup %1687 }
 0x554   :  { %324 = vrot.lane.b32.xlu0 %v1795_v43, %s1751_s13  ;;  %v470_v43 = vsel %vm441_vm13, %v1688_v54, 0.0 }
 0x555   :  { %v1690_v55 = vpop.eup %1689 }
 0x556   :  { %328 = vrot.lane.b32.xlu1 %v1789_v41, %s1751_s13  ;;  %v467_v41 = vsel %vm441_vm13, %v1690_v55, 0.0 }
 0x55a   :  { %326 = vrot.lane.b32.xlu1 %v1792_v42, %s1751_s13 }
 0x55e   :  { %322 = vrot.lane.b32.xlu1 %v1798_v44, %s1751_s13 }
 0x573   :  { %471 = vadd.xlane.f32.xlu0 %v470_v43 }
 0x577   :  { %468 = vadd.xlane.f32.xlu0 %v467_v41 }
 0x5c2   :  { %v482_v56 = vpop.permute.xlu0 %481 }
 0x5c3   :  { %v488_v42 = vsel %vm441_vm13, %v482_v56, 0.0 }
 0x5c4   :  { %489 = vadd.xlane.f32.xlu0 %v488_v42  ;;  %v480_v57 = vpop.permute.xlu1 %479 }
 0x5c5   :  { %v485_v63 = vsel %vm441_vm13, %v480_v57, 0.0 }
 0x5c6   :  { %v325_v44 = vpop.permute.xlu0 %324 }
 0x5c7   :  { %v335_v60 = vmul.f32 %v325_v44, %v1809_v11  ;;  %v1460_v44 = vld [vmem:[#allocation2 + $0x50] ss:$0 sm:$0xff] }
 0x5c8   :  { %v329_v58 = vpop.permute.xlu1 %328 }
 0x5c9   :  { %v337_v59 = vmul.f32 %v329_v58, %v1809_v11 }
 0x5cb   :  { %507 = vrot.lane.b32.xlu1 %v337_v59, %s1755_s21 }
 0x5cc   :  { %v327_v61 = vpop.permute.xlu1 %326 }
 0x5cd   :  { %v336_v62 = vmul.f32 %v327_v61, %v1811_v13 }
 0x5cf   :  { %503 = vrot.lane.b32.xlu1 %v335_v60, %s1755_s21 }
 0x5d0   :  { %v323_v0 = vpop.permute.xlu1 %322 }
 0x5d1   :  { %v334_v1 = vmul.f32 %v323_v0, %v1811_v13 }
 0x5da   :  { %505 = vrot.lane.b32.xlu0 %v336_v62, %s1755_s21  ;;  %v1461_v62 = vld [vmem:[#allocation2 + $0x58] ss:$0 sm:$0xff] }
 0x5f3   :  { %486 = vadd.xlane.f32.xlu1 %v485_v63 }
 0x5fc   :  { %v472_v4 = vpop.xlane.xlu0 %471 }
 0x600   :  { %v469_v5 = vpop.xlane.xlu0 %468 }
 0x604   :  { %501 = vrot.lane.b32.xlu1 %v334_v1, %s1755_s21 }
 0x63d   :  { %v508_v2 = vpop.permute.xlu1 %507 }
 0x63e   :  { %1571 = vmatprep.subr.mxu0 %v508_v2 }
 0x63f   :  { %1572 = vmatpush3.msra.mxu0 %v508_v2 }
 0x641   :  { %v504_v9 = vpop.permute.xlu1 %503 }
 0x64d   :  { %v490_v7 = vpop.xlane.xlu0 %489 }
 0x64e   :  { %1691 = vrcp.f32 %v490_v7  ;;  %v850_v7 = vld [vmem:[#allocation2 + $0x78] sm:$0xff] }
 0x64f   :  { %1693 = vrcp.f32 %v469_v5 }
 0x650   :  { %1695 = vrcp.f32 %v472_v4 }
 0x651   :  { %v506_v8 = vpop.permute.xlu0 %505 }
 0x652   :  { %1573 = vmatprep.subr.mxu0 %v506_v8 }
 0x653   :  { %1574 = vmatpush3.msra.mxu0 %v506_v8  ;;  %v849_v8 = vld [vmem:[#allocation2 + $0x70] sm:$0xff] }
 0x654   :  { %1575 = vmatprep.subr.mxu0 %v504_v9 }
 0x655   :  { %1576 = vmatpush3.msra.mxu0 %v504_v9  ;;  %v1462_v9 = vld [vmem:[#allocation2 + $0x68] ss:$0 sm:$0xff] }
 0x65b   :  { %v1692_v12 = vpop.eup %1691 }
 0x65c   :  { %v1694_v13 = vpop.eup %1693  ;;  %v494_v16 = vmul.f32 %v1692_v12, %v1835_v46 }
 0x65d   :  { %v1696_v14 = vpop.eup %1695  ;;  %v475_v17 = vmul.f32 %v1694_v13, %v1690_v55 }
 0x65e   :  { %v476_v19 = vmul.f32 %v1696_v14, %v1688_v54 }
 0x660   :  { %v496_v21 = vsel %vm441_vm13, %v476_v19, %v494_v16 }
 0x67c   :  { %v487_v10 = vpop.xlane.xlu1 %486 }
 0x67d   :  { %1697 = vrcp.f32 %v487_v10 }
 0x680   :  { %v502_v11 = vpop.permute.xlu1 %501 }
 0x681   :  { %1577 = vmatprep.subr.mxu0 %v502_v11 }
 0x682   :  { %1578 = vmatpush3.msra.mxu0 %v502_v11 }
 0x683   :  { %1592 = vmatprep.subr.mxu0 %v850_v7 }
 0x68a   :  { %v1698_v15 = vpop.eup %1697 }
 0x68b   :  { %v493_v18 = vmul.f32 %v1698_v15, %v1838_v47  ;;  %v741_v47 = vld [vmem:[#allocation2 + $0x60] sm:$0xf] }
 0x68c   :  { %1587 = vmatprep.subr.msk.mxu1 %vm217_vm7, %v741_v47 }
 0x68d   :  { %v495_v20 = vsel %vm441_vm13, %v475_v17, %v493_v18 }
 0x68e   :  { %1579 = vmatprep.mubr.msk.f32.mxu0 %vm513_vm14, %v495_v20 }
 0x68f   :  { %1580 = vmatmul.mubr.msk.f32.vlgmr.msra.gmra.mxu0 %vm513_vm14, %v496_v21 }
 0x690   :  { %1593 = vmatpush3.msra.mxu0 %v850_v7 }
 0x691   :  { %1594 = vmatprep.subr.mxu0 %v849_v8 }
 0x692   :  { %1595 = vmatpush3.msra.mxu0 %v849_v8 }
 0x74f   :  { %v1581_v23 = vpop.f32.mrf.mxu0 }
 0x751   :  { %v586_v24 = vpop.f32.mrf.mxu0 }
 0x752   :  { %1584 = vmatprep.mubr.msk.f32.mxu1 %vm151_vm4, %v586_v24 }
 0x753   :  { %1585 = vmatmul.mubr.msk.f32.vlgmr.msra.gmra.mxu1 %vm151_vm4, %v1581_v23 }
 0x754   :  { %1588 = vmatpush3.msk.msra.mxu1 %vm217_vm7, %v741_v47 }
 0x813   :  { %v1586_v26 = vpop.f32.mrf.mxu1 }
 0x814   :  { %v682_v27 = vadd.f32 %v1586_v26, %v1456_v25 }
 0x815   :  { %v676_v28 = vpop.f32.mrf.mxu1 }
 0x816   :  { %v677_v29 = vadd.f32 %v1456_v25, %v676_v28  ;;  %v686_v30 = vadd.f32 %v682_v27, %v1805_v6 }
 0x818   :  { %v692_v31 = vsel %vm151_vm4, %v686_v30, 0.0  ;;  %v685_v32 = vadd.f32 %v677_v29, %v1801_v3 }
 0x819   :  { %693 = vadd.xlane.f32.xlu1 %v692_v31 }
 0x81a   :  { %v689_v33 = vsel %vm151_vm4, %v685_v32, 0.0 }
 0x81b   :  { %690 = vadd.xlane.f32.xlu0 %v689_v33 }
 0x8a2   :  { %v694_v34 = vpop.xlane.xlu1 %693 }
 0x8a3   :  { %v696_v35 = vmul.f32 0.25, %v694_v34 }
 0x8a4   :  { %v691_v36 = vpop.xlane.xlu0 %690 }
 0x8a5   :  { %v695_v37 = vmul.f32 0.25, %v691_v36  ;;  %v698_v38 = vsub.f32 %v686_v30, %v696_v35 }
 0x8a7   :  { %v697_v39 = vsub.f32 %v685_v32, %v695_v37  ;;  %v700_v46 = vmul.f32 %v698_v38, %v698_v38  ;;  %v714_v0 = vmul.f32 %v1460_v44, %v698_v38  ;;  %v1466_v32 = vld [vmem:[#allocation2 + $0x80] ss:$0 sm:$0xff] }
 0x8a9   :  { %v699_v40 = vmul.f32 %v697_v39, %v697_v39  ;;  %v704_v6 = vsel %vm151_vm4, %v700_v46, 0.0  ;;  %v713_v60 = vmul.f32 %v1460_v44, %v697_v39 }
 0x8ab   :  { %v701_v45 = vsel %vm151_vm4, %v699_v40, 0.0 }
 0x8ac   :  { %702 = vadd.xlane.f32.xlu0 %v701_v45 }
 0x8b0   :  { %705 = vadd.xlane.f32.xlu0 %v704_v6 }
 0x935   :  { %v703_v3 = vpop.xlane.xlu0 %702 }
 0x936   :  { %v707_v48 = vmul.f32 0.33333334, %v703_v3 }
 0x938   :  { %1699 = vrsqrt.f32 %v707_v48  ;;  %vm717_vm15 = vcmp.eq.f32.partialorder %v707_v48, inf  ;;  %v720_v53 = vand.u32 2147483648, %v707_v48  ;;  %vm719_vm0 = vcmp.eq.f32.partialorder %v707_v48, 0.0 }
 0x939   :  { %v706_v49 = vpop.xlane.xlu0 %705 }
 0x93a   :  { %v708_v50 = vmul.f32 0.33333334, %v706_v49 }
 0x93c   :  { %1701 = vrsqrt.f32 %v708_v50  ;;  %vm724_vm1 = vcmp.eq.f32.partialorder %v708_v50, inf  ;;  %v727_v42 = vand.u32 2147483648, %v708_v50  ;;  %vm726_vm2 = vcmp.eq.f32.partialorder %v708_v50, 0.0 }
 0x945   :  { %v1700_v51 = vpop.eup %1699 }
 0x946   :  { %v716_v52 = vmul.f32 %v1700_v51, %v707_v48 }
 0x948   :  { %v718_v54 = vsel %vm717_vm15, %v707_v48, %v716_v52 }
 0x949   :  { %v1702_v43 = vpop.eup %1701  ;;  %v721_v55 = vsel %vm719_vm0, %v720_v53, %v718_v54  ;;  %v993_v53 = vld [vmem:[#allocation2 + $0x98] sm:$0xf] }
 0x94a   :  { %v729_v41 = vadd.f32 1e-06, %v721_v55  ;;  %v723_v56 = vmul.f32 %v1702_v43, %v708_v50  ;;  %1599 = vmatprep.subr.msk.mxu1 %vm217_vm7, %v993_v53 }
 0x94c   :  { %1703 = vrcp.f32 %v729_v41  ;;  %v725_v57 = vsel %vm724_vm1, %v708_v50, %v723_v56 }
 0x94d   :  { %v728_v58 = vsel %vm726_vm2, %v727_v42, %v725_v57 }
 0x94e   :  { %v730_v59 = vadd.f32 1e-06, %v728_v58 }
 0x950   :  { %1705 = vrcp.f32 %v730_v59 }
 0x959   :  { %v1704_v61 = vpop.eup %1703 }
 0x95a   :  { %v732_v63 = vmul.f32 %v1704_v61, %v713_v60 }
 0x95c   :  { %v739_v1 = vadd.f32 %v1461_v62, %v732_v63 }
 0x95d   :  { %v1706_v2 = vpop.eup %1705 }
 0x95e   :  { %v734_v4 = vmul.f32 %v1706_v2, %v714_v0  ;;  %1589 = vmatprep.mubr.msk.f32.mxu1 %vm151_vm4, %v739_v1  ;;  %v1469_v2 = vld [vmem:[#allocation2 + $0x88] ss:$0 sm:$0xff] }
 0x960   :  { %v740_v5 = vadd.f32 %v1461_v62, %v734_v4 }
 0x962   :  { %1590 = vmatmul.mubr.msk.f32.vlgmr.msra.gmra.mxu1 %vm151_vm4, %v740_v5 }
 0x963   :  { %1600 = vmatpush3.msk.msra.mxu1 %vm217_vm7, %v993_v53  ;;  %v1326_v53 = vld [vmem:[#allocation2 + $0xd8] sm:$0xff] }
 0xa22   :  { %v1591_v10 = vpop.f32.mrf.mxu1 }
 0xa23   :  { %v828_v11 = vadd.f32 %v1591_v10, %v1462_v9  ;;  %v1470_v10 = vld [vmem:[#allocation2 + $0x90] ss:$0 sm:$0xff] }
 0xa24   :  { %v822_v12 = vpop.f32.mrf.mxu1 }
 0xa25   :  { %v834_v13 = vmul.f32 0.044715, %v828_v11  ;;  %v823_v14 = vadd.f32 %v1462_v9, %v822_v12  ;;  %v832_v29 = vmul.f32 0.5, %v828_v11 }
 0xa27   :  { %v836_v15 = vmul.f32 %v834_v13, %v828_v11  ;;  %v833_v16 = vmul.f32 0.044715, %v823_v14  ;;  %v831_v27 = vmul.f32 0.5, %v823_v14 }
 0xa29   :  { %v838_v17 = vmul.f32 %v836_v15, %v828_v11  ;;  %v835_v18 = vmul.f32 %v833_v16, %v823_v14  ;;  %v1078_v16 = vld [vmem:[#allocation2 + $0x170] sm:$0xff] }
 0xa2b   :  { %v840_v19 = vadd.f32 %v838_v17, %v828_v11  ;;  %v837_v20 = vmul.f32 %v835_v18, %v823_v14 }
 0xa2d   :  { %v842_v21 = vmul.f32 0.7978846, %v840_v19  ;;  %v839_v22 = vadd.f32 %v837_v20, %v823_v14 }
 0xa2f   :  { %1707 = vtanh.f32 %v842_v21  ;;  %v841_v23 = vmul.f32 0.7978846, %v839_v22 }
 0xa31   :  { %1709 = vtanh.f32 %v841_v23  ;;  %v1079_v23 = vld [vmem:[#allocation2 + $0x178] sm:$0xff] }
 0xa3c   :  { %v1708_v24 = vpop.eup %1707 }
 0xa3d   :  { %v846_v26 = vadd.f32 1.0, %v1708_v24  ;;  %v1080_v24 = vld [vmem:[#allocation2 + $0x180] sm:$0xff] }
 0xa3e   :  { %v1710_v25 = vpop.eup %1709 }
 0xa3f   :  { %v845_v28 = vadd.f32 1.0, %v1710_v25  ;;  %v848_v31 = vmul.f32 %v846_v26, %v832_v29  ;;  %v1081_v25 = vld [vmem:[#allocation2 + $0x188] sm:$0xff] }
 0xa40   :  { %v1212_v26 = vld [vmem:[#allocation2 + $0xa8] sm:$0xf] }
 0xa41   :  { %v847_v30 = vmul.f32 %v845_v28, %v831_v27  ;;  %1618 = vmatprep.subr.msk.mxu1 %vm217_vm7, %v1212_v26  ;;  %v1337_v27 = vld [vmem:[#allocation2 + $0x130] sm:$0xff] }
 0xa43   :  { %1596 = vmatprep.mubr.msk.f32.mxu0 %vm441_vm13, %v847_v30 }
 0xa44   :  { %1597 = vmatmul.mubr.msk.f32.vlgmr.msra.gmra.mxu0 %vm441_vm13, %v848_v31  ;;  %v1478_v31 = vld [vmem:[#allocation2 + $0xa0] ss:$0 sm:$0xff] }
 0xa45   :  { %1612 = vmatprep.mubr.msk.f32.mxu0 %vm513_vm14, %v1078_v16 }
 0xb04   :  { %v1598_v33 = vpop.f32.mrf.mxu0 }
 0xb05   :  { %v934_v34 = vadd.f32 %v1598_v33, %v1466_v32 }
 0xb06   :  { %v928_v35 = vpop.f32.mrf.mxu0 }
 0xb07   :  { %v929_v36 = vadd.f32 %v1466_v32, %v928_v35  ;;  %v938_v37 = vadd.f32 %v934_v34, %v740_v5 }
 0xb09   :  { %v944_v38 = vsel %vm151_vm4, %v938_v37, 0.0  ;;  %v937_v39 = vadd.f32 %v929_v36, %v739_v1 }
 0xb0a   :  { %945 = vadd.xlane.f32.xlu0 %v944_v38 }
 0xb0b   :  { %v941_v40 = vsel %vm151_vm4, %v937_v39, 0.0 }
 0xb0c   :  { %942 = vadd.xlane.f32.xlu1 %v941_v40 }
 0xb93   :  { %v946_v45 = vpop.xlane.xlu0 %945 }
 0xb94   :  { %v948_v46 = vmul.f32 0.25, %v946_v45  ;;  %v1335_v45 = vld [vmem:[#allocation2 + $0x120] sm:$0xff] }
 0xb95   :  { %v943_v6 = vpop.xlane.xlu1 %942 }
 0xb96   :  { %v950_v47 = vsub.f32 %v938_v37, %v948_v46  ;;  %v947_v3 = vmul.f32 0.25, %v943_v6  ;;  %v1334_v6 = vld [vmem:[#allocation2 + $0x118] sm:$0xff] }
 0xb98   :  { %v949_v48 = vsub.f32 %v937_v39, %v947_v3  ;;  %v952_v49 = vmul.f32 %v950_v47, %v950_v47  ;;  %v966_v5 = vmul.f32 %v1469_v2, %v950_v47  ;;  %v1336_v39 = vld [vmem:[#allocation2 + $0x128] sm:$0xff]  ;;  %v1333_v47 = vld [vmem:[#allocation2 + $0x110] sm:$0xff] }
 0xb99   :  { %v1332_v3 = vld [vmem:[#allocation2 + $0x108] sm:$0xff] }
 0xb9a   :  { %v956_v50 = vsel %vm151_vm4, %v952_v49, 0.0  ;;  %v951_v51 = vmul.f32 %v949_v48, %v949_v48  ;;  %v965_v7 = vmul.f32 %v1469_v2, %v949_v48  ;;  %v1331_v48 = vld [vmem:[#allocation2 + $0x100] sm:$0xff]  ;;  %v1330_v49 = vld [vmem:[#allocation2 + $0xf8] sm:$0xff] }
 0xb9b   :  { %957 = vadd.xlane.f32.xlu0 %v956_v50  ;;  %v1329_v50 = vld [vmem:[#allocation2 + $0xf0] sm:$0xff] }
 0xb9c   :  { %v953_v52 = vsel %vm151_vm4, %v951_v51, 0.0  ;;  %v1328_v51 = vld [vmem:[#allocation2 + $0xe8] sm:$0xff] }
 0xb9d   :  { %954 = vadd.xlane.f32.xlu1 %v953_v52  ;;  %v1327_v52 = vld [vmem:[#allocation2 + $0xe0] sm:$0xff] }
 0xc24   :  { %v958_v54 = vpop.xlane.xlu0 %957 }
 0xc25   :  { %v960_v43 = vmul.f32 0.33333334, %v958_v54  ;;  %v1325_v54 = vld [vmem:[#allocation2 + $0xd0] sm:$0xff] }
 0xc26   :  { %v955_v55 = vpop.xlane.xlu1 %954 }
 0xc27   :  { %1711 = vrsqrt.f32 %v960_v43  ;;  %v959_v41 = vmul.f32 0.33333334, %v955_v55  ;;  %vm976_vm3 = vcmp.eq.f32.partialorder %v960_v43, inf  ;;  %v979_v57 = vand.u32 2147483648, %v960_v43  ;;  %v1323_v55 = vld [vmem:[#allocation2 + $0xc0] sm:$0xff] }
 0xc28   :  { %vm978_vm5 = vcmp.eq.f32.partialorder %v960_v43, 0.0 }
 0xc29   :  { %1713 = vrsqrt.f32 %v959_v41  ;;  %vm969_vm6 = vcmp.eq.f32.partialorder %v959_v41, inf  ;;  %v972_v62 = vand.u32 2147483648, %v959_v41  ;;  %vm971_vm8 = vcmp.eq.f32.partialorder %v959_v41, 0.0 }
 0xc34   :  { %v1712_v56 = vpop.eup %1711 }
 0xc35   :  { %v975_v42 = vmul.f32 %v1712_v56, %v960_v43  ;;  %v1479_v56 = vld [vmem:[#allocation2 + $0xb0] ss:$0 sm:$0xff] }
 0xc36   :  { %v1714_v58 = vpop.eup %1713 }
 0xc37   :  { %v977_v59 = vsel %vm976_vm3, %v960_v43, %v975_v42  ;;  %v968_v60 = vmul.f32 %v1714_v58, %v959_v41  ;;  %v1324_v43 = vld [vmem:[#allocation2 + $0xc8] sm:$0xff] }
 0xc38   :  { %v980_v44 = vsel %vm978_vm5, %v979_v57, %v977_v59 }
 0xc39   :  { %v982_v61 = vadd.f32 1e-06, %v980_v44  ;;  %v970_v63 = vsel %vm969_vm6, %v959_v41, %v968_v60  ;;  %v1322_v41 = vld [vmem:[#allocation2 + $0xb8] sm:$0xff] }
 0xc3a   :  { %v973_v0 = vsel %vm971_vm8, %v972_v62, %v970_v63 }
 0xc3b   :  { %1715 = vrcp.f32 %v982_v61  ;;  %v981_v1 = vadd.f32 1e-06, %v973_v0 }
 0xc3d   :  { %1717 = vrcp.f32 %v981_v1 }
 0xc48   :  { %v1716_v4 = vpop.eup %1715 }
 0xc49   :  { %v986_v9 = vmul.f32 %v1716_v4, %v966_v5  ;;  %v1485_v4 = vld [vmem:[#allocation2 + $0x138] ss:$0 sm:$0xff] }
 0xc4a   :  { %v1718_v8 = vpop.eup %1717 }
 0xc4b   :  { %v984_v11 = vmul.f32 %v1718_v8, %v965_v7  ;;  %v992_v13 = vadd.f32 %v1470_v10, %v986_v9 }
 0xc4d   :  { %v991_v12 = vadd.f32 %v1470_v10, %v984_v11 }
 0xc4f   :  { %1601 = vmatprep.mubr.msk.f32.mxu1 %vm151_vm4, %v991_v12 }
 0xc50   :  { %1602 = vmatmul.mubr.msk.f32.vlgmr.msra.gmra.mxu1 %vm151_vm4, %v992_v13 }
 0xc51   :  { %1619 = vmatpush3.msk.msra.mxu1 %vm217_vm7, %v1212_v26 }
 0xc52   :  { %1626 = vmatprep.subr.mxu1 %v1337_v27 }
 0xd10   :  { %v1603_v14 = vpop.f32.mrf.mxu1 }
 0xd11   :  { %1086 = vrot.lane.b32.xlu1 %v1603_v14, %s1755_s21 }
 0xd12   :  { %v1069_v15 = vpop.f32.mrf.mxu1 }
 0xd13   :  { %1084 = vrot.lane.b32.xlu0 %v1069_v15, %s1755_s21 }
 0xd17   :  { %1090 = vrot.lane.b32.xlu0 %v1603_v14, %s1752_s1 }
 0xd83   :  { %v1087_v17 = vpop.permute.xlu1 %1086 }
 0xd84   :  { %1094 = vrot.lane.b32.xlu1 %v1087_v17, %s1752_s1 }
 0xd85   :  { %v1085_v18 = vpop.permute.xlu0 %1084 }
 0xd88   :  { %1092 = vrot.lane.b32.xlu1 %v1085_v18, %s1752_s1 }
 0xd89   :  { %v1091_v21 = vpop.permute.xlu0 %1090 }
 0xd8c   :  { %1088 = vrot.lane.b32.xlu1 %v1069_v15, %s1752_s1 }
 0xdf6   :  { %v1095_v19 = vpop.permute.xlu1 %1094 }
 0xdf7   :  { %1604 = vmatprep.subr.mxu0 %v1095_v19 }
 0xdf8   :  { %1605 = vmatpush3.msra.mxu0 %v1095_v19 }
 0xdfa   :  { %v1093_v20 = vpop.permute.xlu1 %1092 }
 0xdfb   :  { %1606 = vmatprep.subr.mxu0 %v1093_v20 }
 0xdfc   :  { %1607 = vmatpush3.msra.mxu0 %v1093_v20 }
 0xdfd   :  { %1608 = vmatprep.subr.mxu0 %v1091_v21 }
 0xdfe   :  { %1609 = vmatpush3.msra.mxu0 %v1091_v21  ;;  %v1089_v22 = vpop.permute.xlu1 %1088 }
 0xdff   :  { %1610 = vmatprep.subr.mxu0 %v1089_v22 }
 0xe00   :  { %1611 = vmatpush3.msra.mxu0 %v1089_v22 }
 0xe01   :  { %1613 = vmatmul.mubr.msk.f32.vlgmr.msra.gmra.mxu0 %vm513_vm14, %v1079_v23 }
 0xe02   :  { %1615 = vmatprep.mubr.msk.f32.mxu0 %vm513_vm14, %v1080_v24 }
 0xe05   :  { %1616 = vmatmul.mubr.msk.f32.gmra.mxu0 %vm513_vm14, %v1081_v25 }
 0xec1   :  { %v1614_v28 = vpop.f32.mrf.mxu0 }
 0xec2   :  { %v1200_v29 = vadd.f32 %v1614_v28, %v1603_v14 }
 0xec3   :  { %v1178_v30 = vpop.f32.mrf.mxu0 }
 0xec4   :  { %v1199_v32 = vadd.f32 %v1178_v30, %v1069_v15  ;;  %v1209_v35 = vadd.f32 %v1478_v31, %v1200_v29 }
 0xec5   :  { %v1617_v33 = vpop.f32.mrf.mxu0 }
 0xec6   :  { %v1208_v34 = vadd.f32 %v1478_v31, %v1199_v32  ;;  %v1202_v36 = vadd.f32 %v1617_v33, %v1087_v17 }
 0xec7   :  { %v1188_v37 = vpop.f32.mrf.mxu0 }
 0xec8   :  { %v1201_v38 = vadd.f32 %v1188_v37, %v1085_v18  ;;  %1620 = vmatprep.mubr.msk.f32.mxu1 %vm151_vm4, %v1208_v34  ;;  %v1211_v46 = vadd.f32 %v1478_v31, %v1202_v36 }
 0xec9   :  { %1621 = vmatmul.mubr.msk.f32.vlgmr.msra.gmra.mxu1 %vm151_vm4, %v1209_v35 }
 0xeca   :  { %v1210_v40 = vadd.f32 %v1478_v31, %v1201_v38  ;;  %1627 = vmatpush3.msra.mxu1 %v1337_v27 }
 0xecb   :  { %1628 = vmatprep.subr.mxu1 %v1336_v39 }
 0xecc   :  { %1623 = vmatprep.mubr.msk.f32.mxu1 %vm151_vm4, %v1210_v40  ;;  %1629 = vmatpush3.msra.mxu1 %v1336_v39 }
 0xecd   :  { %1624 = vmatmul.mubr.msk.f32.gmra.mxu1 %vm151_vm4, %v1211_v46  ;;  %1630 = vmatprep.subr.mxu1 %v1335_v45  ;;  %vm1428_vm4 = vcmask 39936  }
 0xece   :  { %1631 = vmatpush3.msra.mxu1 %v1335_v45 }
 0xecf   :  { %1632 = vmatprep.subr.mxu1 %v1334_v6 }
 0xed0   :  { %1633 = vmatpush3.msra.mxu1 %v1334_v6 }
 0xed1   :  { %1634 = vmatprep.subr.mxu1 %v1333_v47 }
 0xed2   :  { %1635 = vmatpush3.msra.mxu1 %v1333_v47 }
 0xed3   :  { %1636 = vmatprep.subr.mxu1 %v1332_v3 }
 0xed4   :  { %1637 = vmatpush3.msra.mxu1 %v1332_v3 }
 0xed5   :  { %1638 = vmatprep.subr.mxu1 %v1331_v48 }
 0xed6   :  { %1639 = vmatpush3.msra.mxu1 %v1331_v48 }
 0xed7   :  { %1640 = vmatprep.subr.mxu1 %v1330_v49 }
 0xed8   :  { %1641 = vmatpush3.msra.mxu1 %v1330_v49 }
 0xed9   :  { %1642 = vmatprep.subr.mxu1 %v1329_v50 }
 0xeda   :  { %1643 = vmatpush3.msra.mxu1 %v1329_v50 }
 0xedb   :  { %1644 = vmatprep.subr.mxu1 %v1328_v51 }
 0xedc   :  { %1645 = vmatpush3.msra.mxu1 %v1328_v51 }
 0xedd   :  { %1646 = vmatprep.subr.mxu1 %v1327_v52 }
 0xede   :  { %1647 = vmatpush3.msra.mxu1 %v1327_v52 }
 0xedf   :  { %1648 = vmatprep.subr.mxu1 %v1326_v53 }
 0xee0   :  { %1649 = vmatpush3.msra.mxu1 %v1326_v53 }
 0xee1   :  { %1650 = vmatprep.subr.mxu1 %v1325_v54 }
 0xee2   :  { %1651 = vmatpush3.msra.mxu1 %v1325_v54 }
 0xee3   :  { %1652 = vmatprep.subr.mxu1 %v1324_v43 }
 0xee4   :  { %1653 = vmatpush3.msra.mxu1 %v1324_v43 }
 0xee5   :  { %1654 = vmatprep.subr.mxu1 %v1323_v55 }
 0xee6   :  { %1655 = vmatpush3.msra.mxu1 %v1323_v55 }
 0xee7   :  { %1656 = vmatprep.subr.mxu1 %v1322_v41 }
 0xee8   :  { %1657 = vmatpush3.msra.mxu1 %v1322_v41 }
 0xf89   :  { %v1622_v42 = vpop.f32.mrf.mxu1 }
 0xf8a   :  { %v1305_v57 = vadd.f32 %v1622_v42, %v1479_v56 }
 0xf8b   :  { %v1299_v58 = vpop.f32.mrf.mxu1 }
 0xf8c   :  { %v1300_v59 = vadd.f32 %v1479_v56, %v1299_v58 }
 0xf8d   :  { %v1625_v44 = vpop.f32.mrf.mxu1 }
 0xf8e   :  { %1719 = vtanh.f32 %v1300_v59  ;;  %v1315_v60 = vadd.f32 %v1625_v44, %v1479_v56 }
 0xf8f   :  { %1721 = vtanh.f32 %v1305_v57  ;;  %v1309_v61 = vpop.f32.mrf.mxu1 }
 0xf90   :  { %v1310_v62 = vadd.f32 %v1479_v56, %v1309_v61 }
 0xf92   :  { %1723 = vtanh.f32 %v1310_v62 }
 0xf93   :  { %1725 = vtanh.f32 %v1315_v60 }
 0xf9b   :  { %v1720_v63 = vpop.eup %1719 }
 0xf9c   :  { %v1722_v0 = vpop.eup %1721  ;;  %1658 = vmatprep.mubr.f32.mxu1 %v1720_v63 }
 0xf9d   :  { %1659 = vmatmul.mubr.f32.vlgmr.msra.gmra.mxu1 %v1722_v0 }
 0xf9f   :  { %v1724_v1 = vpop.eup %1723 }
 0xfa0   :  { %v1726_v2 = vpop.eup %1725  ;;  %1661 = vmatprep.mubr.f32.mxu1 %v1724_v1 }
 0xfa1   :  { %1662 = vmatmul.mubr.f32.gmra.mxu1 %v1726_v2 }
0x105d   :  { %v1660_v5 = vpop.f32.mrf.mxu1 }
0x105e   :  { %v1415_v7 = vadd.f32 %v1660_v5, %v1485_v4 }
0x105f   :  { %v1409_v8 = vpop.f32.mrf.mxu1 }
0x1060   :  { %1430 = vst.msk [vmem:[%s1921_s2 + $0x8] sm:$0xff] %vm1428_vm4, %v1415_v7  ;;  %v1410_v9 = vadd.f32 %v1485_v4, %v1409_v8 }
0x1061   :  { %v1663_v10 = vpop.f32.mrf.mxu1 }
0x1062   :  { %1429 = vst.msk [vmem:[%s1921_s2] sm:$0xff] %vm1428_vm4, %v1410_v9  ;;  %v1425_v11 = vadd.f32 %v1663_v10, %v1485_v4 }
0x1063   :  { %v1419_v12 = vpop.f32.mrf.mxu1 }
0x1064   :  { %1432 = vst.msk [vmem:[%s1921_s2 + $0x18] sm:$0xff] %vm1428_vm4, %v1425_v11  ;;  %v1420_v13 = vadd.f32 %v1485_v4, %v1419_v12 }
0x1066   :  { %1431 = vst.msk [vmem:[%s1921_s2 + $0x10] sm:$0xff] %vm1428_vm4, %v1420_v13 }
0x1067   :  { %1437 = vsyncpa [#allocation3], 1 }

</bundles_post_ra>
